<compile_context>
chip_gen: v7x
topology: tpu7x:2x2x1
jax: 0.10.0
libtpu: 0.0.40
codegen_flags: <defaults>
</compile_context>

<pallas_src>
import functools

import jax
import jax.numpy as jnp
from jax.experimental import pallas as pl
from jax.experimental.pallas import tpu as pltpu


def _tpu_generation():
    """Best-effort TPU generation from device_kind; 0 if unknown (safe path)."""
    try:
        kind = jax.devices()[0].device_kind.lower()
    except Exception:
        return 0
    for g in (7, 6, 5, 4, 3, 2):
        if f"v{g}" in kind:
            return g
    return 0


def _ex_attention_kernel(x_ref, wf0_ref, bf0_ref, wf1_ref, gamma_ref, beta_ref,
                         o_ref, *, k_valid, exp_bf16):
    """One (NB, L, C) batch block per grid step; all operands VMEM-resident."""
    nb, l, c = x_ref.shape
    kp = wf0_ref.shape[1]                              # lane-padded K
    x = x_ref[...]                                     # (NB, L, C) f32 residual
    x2 = x.reshape(nb * l, c)

    # fused conv1 + linear_0:  s = x @ (Wc1 @ W0) + b1 @ W0     -> (NB*L, Kp)
    s = jnp.dot(x2.astype(jnp.bfloat16), wf0_ref[...],
                preferred_element_type=jnp.float32) + bf0_ref[...]
    s3 = s.reshape(nb, l, kp)

    # softmax over the token axis (per batch element, per memory unit);
    # exp in bf16 on v6e/v7x (bf16 EUP), f32 elsewhere; exact (NB,1,Kp) divide
    # folded into a reciprocal-then-multiply.
    mx = jnp.max(s3, axis=1, keepdims=True)
    if exp_bf16:
        e = jnp.exp((s3 - mx).astype(jnp.bfloat16)).astype(jnp.float32)
    else:
        e = jnp.exp(s3 - mx)
    inv_denom = 1.0 / jnp.sum(e, axis=1, keepdims=True)         # (NB, 1, Kp)
    attn = e * inv_denom

    # double normalization over the K memory units; padded columns masked out
    # of the sum (they hold the uniform 1/L softmax of the zero-padded logits).
    if k_valid < kp:
        lane = jax.lax.broadcasted_iota(jnp.int32, (1, 1, kp), 2)
        attn_valid = jnp.where(lane < k_valid, attn, 0.0)
    else:
        attn_valid = attn
    ksum = 1e-9 + jnp.sum(attn_valid, axis=2, keepdims=True)    # (NB, L, 1)
    # approx reciprocal: the per-token uniform scale (and its rcp error) is
    # removed by the LayerNorm below up to its 1e-6 eps term.
    attn = attn * pl.reciprocal(ksum, approx=True)

    # fused linear_1 + conv2:  w = attn @ (W1 @ Wc2)            -> (NB*L, C)
    # (zero-padded K rows of Wf1 kill the padded attn columns exactly)
    w = jnp.dot(attn.reshape(nb * l, kp).astype(jnp.bfloat16), wf1_ref[...],
                preferred_element_type=jnp.float32)

    # LayerNorm over channels (eps=1e-6), gamma folded into the rsqrt scale,
    # variance clamped at 0 (E[w^2]-mu^2 cancellation form).
    mu = jnp.mean(w, axis=-1, keepdims=True)
    var = jnp.maximum(jnp.mean(w * w, axis=-1, keepdims=True) - mu * mu, 0.0)
    scale = gamma_ref[...] * jax.lax.rsqrt(var + 1e-6)
    w = (w - mu) * scale + beta_ref[...]

    # residual + ReLU (dropout_layer=None -> identity)
    o_ref[...] = jnp.maximum(w.reshape(nb, l, c) + x, 0.0)


def prepare_ex_attention_params(params, lane=128):
    """One-time parameter preprocessing (hoisted out of the forward pass):
    fuse the linear chain, zero-pad K to a lane multiple, cast MXU operands
    to bf16.  Returns (prepared_params, K)."""
    wc1, b1, w0, w1, wc2, gamma, beta = [jnp.asarray(p, jnp.float32) for p in params]
    C, K = w0.shape
    Kp = -(-K // lane) * lane
    wf0 = jnp.dot(wc1, w0)                             # (C, K)
    bf0 = jnp.dot(b1.reshape(1, -1), w0)               # (1, K)
    wf1 = jnp.dot(w1, wc2)                             # (K, C)
    if Kp != K:
        wf0 = jnp.pad(wf0, ((0, 0), (0, Kp - K)))
        bf0 = jnp.pad(bf0, ((0, 0), (0, Kp - K)))
        wf1 = jnp.pad(wf1, ((0, Kp - K), (0, 0)))
    prepared = (wf0.astype(jnp.bfloat16), bf0, wf1.astype(jnp.bfloat16),
                gamma.reshape(1, -1), beta.reshape(1, -1))
    return prepared, int(K)


def _pick_batch_block(n, l, c, kp, vmem_limit, min_steps):
    """Largest batch block whose real per-step footprint (2x double-buffered
    x block + 2x out block + ~6 live f32 intermediates + weights) fits ~70%
    of the VMEM limit, while keeping >= min_steps grid iterations when N
    allows it."""
    wts = 2 * (c * kp * 2 + kp * 4 + kp * c * 2 + 2 * c * 4)     # dbl-buffered
    def est(nb):
        xo = nb * l * c * 4                  # one f32 x/out block
        inter = nb * l * max(c, kp) * 4      # one f32 (NB*L, max(C,Kp)) buffer
        return 4 * xo + 6 * inter + wts
    budget = int(vmem_limit * 0.7)
    best = 1
    for nb in range(1, n + 1):
        if est(nb) > budget:
            break
        if nb == 1 or pl.cdiv(n, nb) >= min_steps:
            best = nb
    return best


@functools.partial(jax.jit, static_argnames=("hw_shape", "k_valid"))
def ex_attention(x, hw_shape, prepared, k_valid):
    """x: (N, L, C) float32, L == H*W.  `prepared` from prepare_ex_attention_params."""
    N, L, C = x.shape
    H, W = hw_shape
    assert L == H * W, "hw_shape must match sequence length"
    wf0, bf0, wf1, gamma, beta = prepared
    Kp = wf0.shape[1]

    gen = _tpu_generation()
    if gen >= 7:                       # v7x: 64 MiB physical VMEM, 2 TC/chip
        vmem_limit, min_steps = 48 * 1024 * 1024, 4
    elif gen >= 4:                     # v4/v5e/v6e: 128 MiB physical VMEM, 1 TC
        vmem_limit, min_steps = 96 * 1024 * 1024, 2
    else:                              # unknown / older: conservative
        vmem_limit, min_steps = 32 * 1024 * 1024, 2
    exp_bf16 = gen >= 6                # bf16 EUP only on v6e / v7x

    NB = _pick_batch_block(N, L, C, Kp, vmem_limit, min_steps)
    steps = pl.cdiv(N, NB)
    Np = steps * NB
    xp = x if Np == N else jnp.pad(x, ((0, Np - N), (0, 0), (0, 0)))

    kernel = functools.partial(_ex_attention_kernel,
                               k_valid=k_valid, exp_bf16=exp_bf16)
    full = lambda shape: pl.BlockSpec(shape, lambda b: (0,) * len(shape))
    grid_spec = pltpu.PrefetchScalarGridSpec(
        num_scalar_prefetch=0,
        grid=(steps,),
        in_specs=[
            pl.BlockSpec((NB, L, C), lambda b: (b, 0, 0)),   # x
            full((C, Kp)),                                   # fused Wc1@W0
            full((1, Kp)),                                   # fused b1@W0
            full((Kp, C)),                                   # fused W1@Wc2
            full((1, C)),                                    # LN gamma
            full((1, C)),                                    # LN beta
        ],
        out_specs=pl.BlockSpec((NB, L, C), lambda b: (b, 0, 0)),
    )
    out = pl.pallas_call(
        kernel,
        out_shape=jax.ShapeDtypeStruct((Np, L, C), jnp.float32),
        grid_spec=grid_spec,
        input_output_aliases={0: 0},       # out block reuses x's HBM block
        compiler_params=pltpu.CompilerParams(
            dimension_semantics=("parallel",),
            vmem_limit_bytes=vmem_limit),
    )(xp, wf0, bf0, wf1, gamma, beta)
    return out if Np == N else out[:N]


def _reference(x, params):
    """Pure-JAX f32 reference of the same forward pass (unfused weights)."""
    wc1, b1, w0, w1, wc2, gamma, beta = params
    y = x @ wc1 + b1
    a = y @ w0
    a = jax.nn.softmax(a, axis=1)                     # softmax over tokens (L)
    a = a / (1e-9 + jnp.sum(a, axis=2, keepdims=True))
    z = a @ w1
    w = z @ wc2
    mu = jnp.mean(w, axis=-1, keepdims=True)
    var = jnp.mean((w - mu) ** 2, axis=-1, keepdims=True)
    w = (w - mu) * jax.lax.rsqrt(var + 1e-6) * gamma + beta
    return jnp.maximum(w + x, 0.0)


def _init_params(key, C, K):
    ks = jax.random.split(key, 6)
    wc1 = jax.random.normal(ks[0], (C, C), jnp.float32) * 0.05
    b1 = jax.random.normal(ks[1], (1, C), jnp.float32) * 0.01
    w0 = jax.random.normal(ks[2], (C, K), jnp.float32) * 0.05
    w1 = jax.random.normal(ks[3], (K, C), jnp.float32) * 0.05
    wc2 = jax.random.normal(ks[4], (C, C), jnp.float32) * 0.05
    gamma = jnp.ones((1, C), jnp.float32)
    beta = jnp.zeros((1, C), jnp.float32)
    return (wc1, b1, w0, w1, wc2, gamma, beta)


if __name__ == "__main__":
    key = jax.random.PRNGKey(0)
    kx, kp = jax.random.split(key)

    N, H, W, C = 2, 8, 8, 32          # embed_dims = 32, seq len L = 64
    K = C                             # external-attention memory units
    L = H * W

    x = jax.random.normal(kx, (N, L, C), jnp.float32)
    params = _init_params(kp, C, K)

    prepared, k_valid = prepare_ex_attention_params(params)   # one-time prep
    out = ex_attention(x, (H, W), prepared, k_valid)
    out = jax.block_until_ready(out)

    ref = _reference(x, params)
    assert out.shape == (N, L, C)
    # bf16 MXU matmuls, bf16 exp (v6e/v7x) and approx reciprocal in the kernel
    # vs a pure-f32 reference; LN amplifies relative error, hence 5e-2.
    assert jnp.allclose(out, ref, atol=5e-2, rtol=5e-2), "mismatch vs reference"

    print("KERNEL_OK")
</pallas_src>

<mosaic_0001>
module attributes {stable_mosaic.version = 11 : i64} {
  func.func @_ex_attention_kernel(%arg0: i32, %arg1: memref<1x64x32xf32, #tpu.memory_space<vmem>>, %arg2: memref<32x128xbf16, #tpu.memory_space<vmem>>, %arg3: memref<1x128xf32, #tpu.memory_space<vmem>>, %arg4: memref<128x32xbf16, #tpu.memory_space<vmem>>, %arg5: memref<1x32xf32, #tpu.memory_space<vmem>>, %arg6: memref<1x32xf32, #tpu.memory_space<vmem>>, %arg7: memref<1x64x32xf32, #tpu.memory_space<vmem>>) attributes {dimension_semantics = [#tpu.dimension_semantics<parallel>], iteration_bounds = array<i64: 2>, scalar_prefetch = 0 : i64, scratch_operands = 0 : i64, tpu.core_type = #tpu.core_type<tc>, window_params = [{transform_indices = @transform_0, window_bounds = array<i64: 1, 64, 32>}, {pipeline_mode = #tpu.pipeline_mode<synchronous>, transform_indices = @transform_1, window_bounds = array<i64: 32, 128>}, {pipeline_mode = #tpu.pipeline_mode<synchronous>, transform_indices = @transform_2, window_bounds = array<i64: 1, 128>}, {pipeline_mode = #tpu.pipeline_mode<synchronous>, transform_indices = @transform_3, window_bounds = array<i64: 128, 32>}, {pipeline_mode = #tpu.pipeline_mode<synchronous>, transform_indices = @transform_4, window_bounds = array<i64: 1, 32>}, {pipeline_mode = #tpu.pipeline_mode<synchronous>, transform_indices = @transform_5, window_bounds = array<i64: 1, 32>}, {transform_indices = @transform_6, window_bounds = array<i64: 1, 64, 32>}]} {
    %c0 = arith.constant 0 : index
    %c0_0 = arith.constant 0 : index
    %c0_1 = arith.constant 0 : index
    %0 = vector.load %arg1[%c0, %c0_0, %c0_1] : memref<1x64x32xf32, #tpu.memory_space<vmem>>, vector<1x64x32xf32>
    %1 = vector.shape_cast %0 : vector<1x64x32xf32> to vector<64x32xf32>
    %2 = arith.truncf %1 : vector<64x32xf32> to vector<64x32xbf16>
    %c0_2 = arith.constant 0 : index
    %c0_3 = arith.constant 0 : index
    %3 = vector.load %arg2[%c0_2, %c0_3] : memref<32x128xbf16, #tpu.memory_space<vmem>>, vector<32x128xbf16>
    %cst = arith.constant dense<0.000000e+00> : vector<64x128xf32>
    %4 = tpu.matmul %2, %3, %cst {dimension_numbers = #tpu.dot_dimension_numbers<[1], [0], [0], [1], [0, 0, 1, 1], [], []>} : vector<64x32xbf16>, vector<32x128xbf16>, vector<64x128xf32> -> vector<64x128xf32>
    %c0_4 = arith.constant 0 : index
    %c0_5 = arith.constant 0 : index
    %5 = vector.load %arg3[%c0_4, %c0_5] : memref<1x128xf32, #tpu.memory_space<vmem>>, vector<1x128xf32>
    %6 = vector.broadcast %5 : vector<1x128xf32> to vector<64x128xf32>
    %7 = arith.addf %4, %6 : vector<64x128xf32>
    %8 = vector.shape_cast %7 : vector<64x128xf32> to vector<1x64x128xf32>
    %cst_6 = arith.constant dense<0xFF800000> : vector<1x128xf32>
    %9 = vector.multi_reduction <maximumf>, %8, %cst_6 [1] : vector<1x64x128xf32> to vector<1x128xf32>
    %10 = vector.shape_cast %9 : vector<1x128xf32> to vector<1x1x128xf32>
    %11 = vector.broadcast %10 : vector<1x1x128xf32> to vector<1x64x128xf32>
    %12 = arith.subf %8, %11 : vector<1x64x128xf32>
    %13 = math.exp %12 : vector<1x64x128xf32>
    %cst_7 = arith.constant dense<0.000000e+00> : vector<1x128xf32>
    %14 = vector.multi_reduction <add>, %13, %cst_7 [1] : vector<1x64x128xf32> to vector<1x128xf32>
    %15 = vector.shape_cast %14 : vector<1x128xf32> to vector<1x1x128xf32>
    %cst_8 = arith.constant 1.000000e+00 : f32
    %16 = vector.broadcast %cst_8 : f32 to vector<1x1x128xf32>
    %17 = arith.divf %16, %15 : vector<1x1x128xf32>
    %18 = vector.broadcast %17 : vector<1x1x128xf32> to vector<1x64x128xf32>
    %19 = arith.mulf %13, %18 : vector<1x64x128xf32>
    %20 = tpu.iota {dimensions = array<i32: 2>} : vector<1x1x128xi32>
    %c32_i32 = arith.constant 32 : i32
    %21 = vector.broadcast %c32_i32 : i32 to vector<1x1x128xi32>
    %22 = arith.cmpi slt, %20, %21 : vector<1x1x128xi32>
    %cst_9 = arith.constant 0.000000e+00 : f32
    %23 = vector.shape_cast %22 : vector<1x1x128xi1> to vector<1x1x128xi1>
    %24 = vector.broadcast %23 : vector<1x1x128xi1> to vector<1x64x128xi1>
    %25 = vector.broadcast %cst_9 : f32 to vector<1x64x128xf32>
    %26 = arith.select %24, %19, %25 : vector<1x64x128xi1>, vector<1x64x128xf32>
    %cst_10 = arith.constant dense<0.000000e+00> : vector<1x64xf32>
    %27 = vector.multi_reduction <add>, %26, %cst_10 [2] : vector<1x64x128xf32> to vector<1x64xf32>
    %28 = vector.shape_cast %27 : vector<1x64xf32> to vector<1x64x1xf32>
    %cst_11 = arith.constant 9.99999971E-10 : f32
    %29 = vector.broadcast %cst_11 : f32 to vector<1x64x1xf32>
    %30 = arith.addf %29, %28 : vector<1x64x1xf32>
    %31 = tpu.reciprocal %30 {approx = true} : vector<1x64x1xf32> -> vector<1x64x1xf32>
    %32 = vector.broadcast %31 : vector<1x64x1xf32> to vector<1x64x128xf32>
    %33 = arith.mulf %19, %32 : vector<1x64x128xf32>
    %34 = vector.shape_cast %33 : vector<1x64x128xf32> to vector<64x128xf32>
    %35 = arith.truncf %34 : vector<64x128xf32> to vector<64x128xbf16>
    %c0_12 = arith.constant 0 : index
    %c0_13 = arith.constant 0 : index
    %36 = vector.load %arg4[%c0_12, %c0_13] : memref<128x32xbf16, #tpu.memory_space<vmem>>, vector<128x32xbf16>
    %cst_14 = arith.constant dense<0.000000e+00> : vector<64x32xf32>
    %37 = tpu.matmul %35, %36, %cst_14 {dimension_numbers = #tpu.dot_dimension_numbers<[1], [0], [0], [1], [0, 0, 1, 1], [], []>} : vector<64x128xbf16>, vector<128x32xbf16>, vector<64x32xf32> -> vector<64x32xf32>
    %cst_15 = arith.constant dense<0.000000e+00> : vector<64xf32>
    %38 = vector.multi_reduction <add>, %37, %cst_15 [1] : vector<64x32xf32> to vector<64xf32>
    %39 = vector.shape_cast %38 : vector<64xf32> to vector<64x1xf32>
    %cst_16 = arith.constant 3.200000e+01 : f32
    %40 = vector.broadcast %cst_16 : f32 to vector<64x1xf32>
    %41 = arith.divf %39, %40 : vector<64x1xf32>
    %42 = arith.mulf %37, %37 : vector<64x32xf32>
    %cst_17 = arith.constant dense<0.000000e+00> : vector<64xf32>
    %43 = vector.multi_reduction <add>, %42, %cst_17 [1] : vector<64x32xf32> to vector<64xf32>
    %44 = vector.shape_cast %43 : vector<64xf32> to vector<64x1xf32>
    %cst_18 = arith.constant 3.200000e+01 : f32
    %45 = vector.broadcast %cst_18 : f32 to vector<64x1xf32>
    %46 = arith.divf %44, %45 : vector<64x1xf32>
    %47 = arith.mulf %41, %41 : vector<64x1xf32>
    %48 = arith.subf %46, %47 : vector<64x1xf32>
    %cst_19 = arith.constant 0.000000e+00 : f32
    %49 = vector.broadcast %cst_19 : f32 to vector<64x1xf32>
    %50 = arith.maximumf %48, %49 : vector<64x1xf32>
    %c0_20 = arith.constant 0 : index
    %c0_21 = arith.constant 0 : index
    %51 = vector.load %arg5[%c0_20, %c0_21] : memref<1x32xf32, #tpu.memory_space<vmem>>, vector<1x32xf32>
    %cst_22 = arith.constant 9.99999997E-7 : f32
    %52 = vector.broadcast %cst_22 : f32 to vector<64x1xf32>
    %53 = arith.addf %50, %52 : vector<64x1xf32>
    %54 = math.rsqrt %53 : vector<64x1xf32>
    %55 = vector.broadcast %51 : vector<1x32xf32> to vector<64x32xf32>
    %56 = vector.broadcast %54 : vector<64x1xf32> to vector<64x32xf32>
    %57 = arith.mulf %55, %56 : vector<64x32xf32>
    %58 = vector.broadcast %41 : vector<64x1xf32> to vector<64x32xf32>
    %59 = arith.subf %37, %58 : vector<64x32xf32>
    %60 = arith.mulf %59, %57 : vector<64x32xf32>
    %c0_23 = arith.constant 0 : index
    %c0_24 = arith.constant 0 : index
    %61 = vector.load %arg6[%c0_23, %c0_24] : memref<1x32xf32, #tpu.memory_space<vmem>>, vector<1x32xf32>
    %62 = vector.broadcast %61 : vector<1x32xf32> to vector<64x32xf32>
    %63 = arith.addf %60, %62 : vector<64x32xf32>
    %64 = vector.shape_cast %63 : vector<64x32xf32> to vector<1x64x32xf32>
    %65 = arith.addf %64, %0 : vector<1x64x32xf32>
    %cst_25 = arith.constant 0.000000e+00 : f32
    %66 = vector.broadcast %cst_25 : f32 to vector<1x64x32xf32>
    %67 = arith.maximumf %65, %66 : vector<1x64x32xf32>
    %c0_26 = arith.constant 0 : index
    %c0_27 = arith.constant 0 : index
    %c0_28 = arith.constant 0 : index
    %68 = vector.load %arg7[%c0_26, %c0_27, %c0_28] : memref<1x64x32xf32, #tpu.memory_space<vmem>>, vector<1x64x32xf32>
    tpu.vector_store %arg7[%c0_26, %c0_27, %c0_28], %67 {strides = array<i32>} : memref<1x64x32xf32, #tpu.memory_space<vmem>>, vector<1x64x32xf32>,
    return
  }
  func.func @transform_0(%arg0: i32) -> (i32, i32, i32) {
    %c0_i32 = arith.constant 0 : i32
    %c0_i32_0 = arith.constant 0 : i32
    %c0_i32_1 = arith.constant 0 : i32
    return %arg0, %c0_i32, %c0_i32_0 : i32, i32, i32
  }
  func.func @transform_1(%arg0: i32) -> (i32, i32) {
    %c0_i32 = arith.constant 0 : i32
    %c0_i32_0 = arith.constant 0 : i32
    %c0_i32_1 = arith.constant 0 : i32
    return %c0_i32, %c0_i32_0 : i32, i32
  }
  func.func @transform_2(%arg0: i32) -> (i32, i32) {
    %c0_i32 = arith.constant 0 : i32
    %c0_i32_0 = arith.constant 0 : i32
    %c0_i32_1 = arith.constant 0 : i32
    return %c0_i32, %c0_i32_0 : i32, i32
  }
  func.func @transform_3(%arg0: i32) -> (i32, i32) {
    %c0_i32 = arith.constant 0 : i32
    %c0_i32_0 = arith.constant 0 : i32
    %c0_i32_1 = arith.constant 0 : i32
    return %c0_i32, %c0_i32_0 : i32, i32
  }
  func.func @transform_4(%arg0: i32) -> (i32, i32) {
    %c0_i32 = arith.constant 0 : i32
    %c0_i32_0 = arith.constant 0 : i32
    %c0_i32_1 = arith.constant 0 : i32
    return %c0_i32, %c0_i32_0 : i32, i32
  }
  func.func @transform_5(%arg0: i32) -> (i32, i32) {
    %c0_i32 = arith.constant 0 : i32
    %c0_i32_0 = arith.constant 0 : i32
    %c0_i32_1 = arith.constant 0 : i32
    return %c0_i32, %c0_i32_0 : i32, i32
  }
  func.func @transform_6(%arg0: i32) -> (i32, i32, i32) {
    %c0_i32 = arith.constant 0 : i32
    %c0_i32_0 = arith.constant 0 : i32
    %c0_i32_1 = arith.constant 0 : i32
    return %arg0, %c0_i32, %c0_i32_0 : i32, i32, i32
  }
}

</mosaic_0001>

<bundles_post_ra>
// kernel: ex_attention.1
= control target key start
LH: loop header
LB: loop body
LE: loop exit
PB: predicated region body
PF: predicated region fallthrough
CT: control target
= control target key end

     0   :  { %s1045_s21 = smov 0   ;;  %s1321_s0 = inlined_call_operand.vmem [shape: f32[2,64,32], index: 0, kind: input, shape index: {}, may-alias: {0,6}]   ;;  %s1322_s1 = inlined_call_operand.vmem [shape: bf16[32,128], index: 1, kind: input, shape index: {}]   ;;  %s1323_s2 = inlined_call_operand.vmem [shape: f32[1,128], index: 2, kind: input, shape index: {}]   ;;  %s1324_s3 = inlined_call_operand.vmem [shape: bf16[128,32], index: 3, kind: input, shape index: {}]   ;;  %s1325_s4 = inlined_call_operand.vmem [shape: f32[1,32], index: 4, kind: input, shape index: {}]   ;;  %s1326_s5 = inlined_call_operand.vmem [shape: f32[1,32], index: 5, kind: input, shape index: {}]   ;;  %s1327_s6 = inlined_call_operand.vmem [shape: f32[2,64,32], index: 6, kind: output, shape index: {}, may-alias: {0,6}]  }
   0x1 LB: > { %s850_s22 = sadd.s32 4294967295, %s1008_s21   ;;  %p854_p0 = scmp.ge.s32.totalorder %s1008_s21, 1  ;;  %s1008_s21 = sphi %s1045_s21, %s16_s21  }
   0x2   : > { %p212_p1 = scmp.lt.s32.totalorder %s1008_s21, 3 }
   0x4   : > { %p213_p2 = pnand %p854_p0, %p212_p1 }
   0x5   : > { %v942_v0 = vld [vmem:[%s1322_s1] sm:$0xff] (!%p213_p2)   ;;  %p242_p3 = scmp.lt.s32.totalorder (!%p213_p2), %s850_s22, 1  ;;  %v943_v1 = vld [vmem:[%s1322_s1 + $0x8] sm:$0xff] (!%p213_p2)   ;;  %vm288_vm0 = vcmask (!%p213_p2), 261120   ;;  %v946_v16 = vld [vmem:[%s1324_s3 + $0x10] sm:$0xff] (!%p213_p2)  }
   0x6   : > { %216 = sbr.rel (%p213_p2) target bundleno = 899 (0x383), region = 44  ;;  %898 = vmatprep.subr.bf16.mxu0 (!%p213_p2), %v942_v0  ;;  %v944_v14 = vld [vmem:[%s1324_s3] sm:$0xff] (!%p213_p2)   ;;  %v945_v15 = vld [vmem:[%s1324_s3 + $0x8] sm:$0xff] (!%p213_p2)  }
   0x7   : > { %899 = vmatpush3.bf16.msra.mxu0 (!%p213_p2), %v942_v0  ;;  %910 = vmatprep.subr.bf16.mxu1 (!%p213_p2), %v944_v14  ;;  %v859_v21 = vld [vmem:[%s1323_s2] ss:$0 sm:$0xff] (!%p213_p2) }
   0x8   : > { %900 = vmatprep.subr.bf16.mxu0 (!%p213_p2), %v943_v1  ;;  %911 = vmatpush3.bf16.msra.mxu1 (!%p213_p2), %v944_v14 }
   0x9   : > { %912 = vmatprep.subr.bf16.mxu1 (!%p213_p2), %v945_v15 }
   0xb   : > { %901 = vmatpush3.bf16.msra.mxu0 (!%p213_p2), %v943_v1 }
   0xc   : > { %913 = vmatpush3.bf16.msra.mxu1 (!%p213_p2), %v945_v15 }
   0xd   : > { %s1329_s22 = smov (!%p242_p3, %s850_s22), 1  ;;  %914 = vmatprep.subr.bf16.mxu1 %v946_v16 }
   0xe   : > { %s878_s27 = sshll.u32 %s1329_s22, 6 }
   0xf   : > { %s246_s30 = scalar_lea.vmem %s1321_s0, %s878_s27  ;;  %s1275_s10 = scalar_lea.vmem %s1327_s6, %s878_s27 }
  0x10   : > { %v1067_v2 = vld [vmem:[%s246_s30] sm:$0xff]  ;;  %v1069_v3 = vld [vmem:[%s246_s30 + $0x8] sm:$0xff]  ;;  %v1071_v4 = vld [vmem:[%s246_s30 + $0x10] sm:$0xff]  ;;  %915 = vmatpush3.bf16.msra.mxu1 %v946_v16 }
  0x11   : > { %v261_v5 = vpack.c.bf16 %v1069_v3, %v1067_v2  ;;  %v1075_v6 = vld [vmem:[%s246_s30 + $0x18] sm:$0xff]  ;;  %v1077_v7 = vld [vmem:[%s246_s30 + $0x20] sm:$0xff]  ;;  %v1079_v8 = vld [vmem:[%s246_s30 + $0x28] sm:$0xff] }
  0x12   : > { %v262_v9 = vpack.c.bf16 %v1075_v6, %v1071_v4  ;;  %v263_v10 = vpack.c.bf16 %v1079_v8, %v1077_v7  ;;  %v1088_v11 = vld [vmem:[%s246_s30 + $0x30] sm:$0xff]  ;;  %v1090_v12 = vld [vmem:[%s246_s30 + $0x38] sm:$0xff] }
  0x13   : > { %902 = vmatprep.mubr.msk.bf16.mxu0 %vm288_vm0, %v261_v5  ;;  %v264_v13 = vpack.c.bf16 %v1090_v12, %v1088_v11 }
  0x14   : > { %903 = vmatmul.mubr.msk.bf16.vlgmr.msra.gmra.mrb[0].mxu0 %vm288_vm0, %v262_v9 }
  0x15   : > { %906 = vmatprep.mubr.msk.bf16.mxu0 %vm288_vm0, %v263_v10 }
  0x1c   : > { %907 = vmatmul.mubr.msk.bf16.gmra.mrb[4].mxu0 %vm288_vm0, %v264_v13 }
  0xe7   : > { %v904_v17 = vpop.f32.mrb[0].mxu0 }
  0xe8   : > { %v335_v18 = vpop.f32.mrb[1].mxu0  ;;  %v344_v23 = vadd.f32 %v904_v17, %v859_v21 }
  0xe9   : > { %v905_v19 = vpop.f32.mrb[2].mxu0  ;;  %v336_v26 = vadd.f32 %v859_v21, %v335_v18 }
  0xea   : > { %v338_v20 = vpop.f32.mrb[3].mxu0  ;;  %v347_v29 = vadd.f32 %v905_v19, %v859_v21 }
  0xeb   : > { %v339_v33 = vadd.f32 %v859_v21, %v338_v20 }
  0xef   : > { %v908_v22 = vpop.f32.mrb[4].mxu0 }
  0xf0   : > { %v360_v24 = vadd.f32 %v908_v22, %v859_v21  ;;  %v351_v25 = vpop.f32.mrb[5].mxu0 }
  0xf1   : > { %v352_v27 = vadd.f32 %v859_v21, %v351_v25  ;;  %v909_v28 = vpop.f32.mrb[6].mxu0 }
  0xf2   : > { %v368_v30 = vmax.f32 %v344_v23, %v360_v24  ;;  %v363_v31 = vadd.f32 %v909_v28, %v859_v21  ;;  %v354_v32 = vpop.f32.mrb[7].mxu0  ;;  %v426_v28 = vlaneseq }
  0xf3   : > { %v366_v34 = vmax.f32 %v336_v26, %v352_v27  ;;  %v355_v35 = vadd.f32 %v859_v21, %v354_v32 }
  0xf4   : > { %v369_v36 = vmax.f32 %v347_v29, %v363_v31 }
  0xf5   : > { %v367_v37 = vmax.f32 %v339_v33, %v355_v35 }
  0xf6   : > { %v371_v38 = vmax.f32 %v368_v30, %v369_v36 }
  0xf7   : > { %v370_v39 = vmax.f32 %v366_v34, %v367_v37 }
  0xf9   : > { %v372_v40 = vmax.f32 %v370_v39, %v371_v38 }
  0xfb   : > { %v373_v41 = vrot.slane %v372_v40, 4 }
  0xfd   : > { %v374_v42 = vmax.f32 %v372_v40, %v373_v41 }
  0xff   : > { %v375_v43 = vrot.slane %v374_v42, 2 }
 0x101   : > { %v376_v44 = vmax.f32 %v374_v42, %v375_v43 }
 0x103   : > { %v377_v45 = vrot.slane %v376_v44, 1 }
 0x105   : > { %v378_v46 = vmax.f32 %v376_v44, %v377_v45 }
 0x107   : > { %v384_v47 = vsub.f32 %v355_v35, %v378_v46  ;;  %v386_v48 = vsub.f32 %v363_v31, %v378_v46  ;;  %v379_v49 = vsub.f32 %v336_v26, %v378_v46  ;;  %v380_v50 = vsub.f32 %v339_v33, %v378_v46 }
 0x108   : > { %v381_v51 = vsub.f32 %v344_v23, %v378_v46  ;;  %v382_v52 = vsub.f32 %v347_v29, %v378_v46  ;;  %v383_v53 = vsub.f32 %v352_v27, %v378_v46  ;;  %v385_v54 = vsub.f32 %v360_v24, %v378_v46 }
 0x109   : > { %v387_v55 = vmul.f32 1.442695, %v379_v49  ;;  %v389_v56 = vmul.f32 1.442695, %v380_v50  ;;  %v397_v60 = vmul.f32 1.442695, %v384_v47 }
 0x10a   : > { %v391_v57 = vmul.f32 1.442695, %v381_v51  ;;  %v393_v58 = vmul.f32 1.442695, %v382_v52  ;;  %v395_v59 = vmul.f32 1.442695, %v383_v53 }
 0x10b   : > { %952 = vpow2.f32 %v387_v55  ;;  %v399_v61 = vmul.f32 1.442695, %v385_v54  ;;  %v401_v62 = vmul.f32 1.442695, %v386_v48  ;;  %v427_v29 = vand.u32 127, %v426_v28  ;;  %v947_v47 = vld [vmem:[%s1324_s3 + $0x18] sm:$0xff]  }
 0x10c   : > { %954 = vpow2.f32 %v389_v56  ;;  %916 = vmatprep.subr.bf16.mxu1 %v947_v47  ;;  %v948_v48 = vld [vmem:[%s1324_s3 + $0x20] sm:$0xff]   ;;  %v949_v49 = vld [vmem:[%s1324_s3 + $0x28] sm:$0xff]   ;;  %v950_v50 = vld [vmem:[%s1324_s3 + $0x30] sm:$0xff]  }
 0x10d   : > { %956 = vpow2.f32 %v391_v57  ;;  %vm428_vm1 = vcmp.lt.s32.totalorder %v427_v29, 32  ;;  %917 = vmatpush3.bf16.msra.mxu1 %v947_v47  ;;  %v951_v51 = vld [vmem:[%s1324_s3 + $0x38] sm:$0xff]  }
 0x10e   : > { %958 = vpow2.f32 %v393_v58  ;;  %918 = vmatprep.subr.bf16.mxu1 %v948_v48 }
 0x10f   : > { %960 = vpow2.f32 %v395_v59 }
 0x110   : > { %962 = vpow2.f32 %v397_v60 }
 0x111   : > { %964 = vpow2.f32 %v399_v61  ;;  %919 = vmatpush3.bf16.msra.mxu1 %v948_v48 }
 0x112   : > { %966 = vpow2.f32 %v401_v62  ;;  %920 = vmatprep.subr.bf16.mxu1 %v949_v49 }
 0x115   : > { %v953_v63 = vpop.eup %952  ;;  %921 = vmatpush3.bf16.msra.mxu1 %v949_v49 }
 0x116   : > { %v955_v0 = vpop.eup %954  ;;  %922 = vmatprep.subr.bf16.mxu1 %v950_v50 }
 0x117   : > { %v403_v1 = vadd.f32 %v955_v0, %v953_v63  ;;  %v957_v5 = vpop.eup %956 }
 0x118   : > { %v959_v10 = vpop.eup %958 }
 0x119   : > { %v404_v9 = vadd.f32 %v957_v5, %v403_v1  ;;  %v961_v14 = vpop.eup %960  ;;  %923 = vmatpush3.bf16.msra.mxu1 %v950_v50 }
 0x11a   : > { %v963_v16 = vpop.eup %962  ;;  %924 = vmatprep.subr.bf16.mxu1 %v951_v51 }
 0x11b   : > { %v405_v13 = vadd.f32 %v959_v10, %v404_v9  ;;  %v965_v18 = vpop.eup %964 }
 0x11c   : > { %v967_v20 = vpop.eup %966 }
 0x11d   : > { %v406_v15 = vadd.f32 %v961_v14, %v405_v13  ;;  %925 = vmatpush3.bf16.msra.mxu1 %v951_v51 }
 0x11f   : > { %v407_v17 = vadd.f32 %v963_v16, %v406_v15 }
 0x121   : > { %v408_v19 = vadd.f32 %v965_v18, %v407_v17 }
 0x123   : > { %v409_v21 = vadd.f32 %v967_v20, %v408_v19 }
 0x125   : > { %v410_v22 = vrot.slane %v409_v21, 4 }
 0x127   : > { %v411_v23 = vadd.f32 %v410_v22, %v409_v21 }
 0x129   : > { %v412_v24 = vrot.slane %v411_v23, 2 }
 0x12b   : > { %v413_v25 = vadd.f32 %v412_v24, %v411_v23 }
 0x12d   : > { %v414_v26 = vrot.slane %v413_v25, 1 }
 0x12f   : > { %v415_v27 = vadd.f32 %v414_v26, %v413_v25 }
 0x131   : > { %968 = vrcp.f32 %v415_v27 }
 0x13b   : > { %v969_v30 = vpop.eup %968 }
 0x13c   : > { %v1107_v31 = vmul.f32 %v969_v30, %v957_v5  ;;  %v1109_v32 = vmul.f32 %v969_v30, %v953_v63  ;;  %v1111_v33 = vmul.f32 %v969_v30, %v959_v10  ;;  %v1113_v34 = vmul.f32 %v969_v30, %v955_v0 }
 0x13d   : > { %v1115_v35 = vmul.f32 %v969_v30, %v963_v16  ;;  %v1117_v36 = vmul.f32 %v969_v30, %v961_v14  ;;  %v1119_v37 = vmul.f32 %v969_v30, %v967_v20  ;;  %v1121_v38 = vmul.f32 %v969_v30, %v965_v18 }
 0x13e   : > { %v433_v39 = vsel %vm428_vm1, %v1107_v31, 0.0  ;;  %v431_v40 = vsel %vm428_vm1, %v1109_v32, 0.0  ;;  %v434_v41 = vsel %vm428_vm1, %v1111_v33, 0.0  ;;  %v432_v42 = vsel %vm428_vm1, %v1113_v34, 0.0 }
 0x13f   : > { %443 = vadd.xlane.f32.xlu1 %v433_v39  ;;  %439 = vadd.xlane.f32.xlu0 %v431_v40  ;;  %v436_v43 = vsel %vm428_vm1, %v1115_v35, 0.0  ;;  %v435_v44 = vsel %vm428_vm1, %v1117_v36, 0.0  ;;  %v438_v45 = vsel %vm428_vm1, %v1119_v37, 0.0  ;;  %v437_v46 = vsel %vm428_vm1, %v1121_v38, 0.0 }
 0x143   : > { %445 = vadd.xlane.f32.xlu1 %v434_v41  ;;  %441 = vadd.xlane.f32.xlu0 %v432_v42 }
 0x147   : > { %449 = vadd.xlane.f32.xlu1 %v436_v43  ;;  %447 = vadd.xlane.f32.xlu0 %v435_v44 }
 0x14b   : > { %453 = vadd.xlane.f32.xlu1 %v438_v45  ;;  %451 = vadd.xlane.f32.xlu0 %v437_v46 }
 0x1cc   : > { %v444_v52 = vpop.xlane.xlu1 %443  ;;  %v440_v53 = vpop.xlane.xlu0 %439 }
 0x1cd   : > { %v457_v54 = vadd.f32 1e-09, %v444_v52  ;;  %v455_v55 = vadd.f32 1e-09, %v440_v53 }
 0x1cf   : > { %970 = vrcp.f32 %v457_v54 }
 0x1d0   : > { %v446_v56 = vpop.xlane.xlu1 %445  ;;  %v442_v57 = vpop.xlane.xlu0 %441  ;;  %972 = vrcp.f32 %v455_v55 }
 0x1d1   : > { %v458_v58 = vadd.f32 1e-09, %v446_v56  ;;  %v456_v59 = vadd.f32 1e-09, %v442_v57 }
 0x1d3   : > { %974 = vrcp.f32 %v458_v58 }
 0x1d4   : > { %976 = vrcp.f32 %v456_v59  ;;  %v450_v60 = vpop.xlane.xlu1 %449  ;;  %v448_v61 = vpop.xlane.xlu0 %447 }
 0x1d5   : > { %v460_v62 = vadd.f32 1e-09, %v450_v60  ;;  %v459_v63 = vadd.f32 1e-09, %v448_v61 }
 0x1d7   : > { %978 = vrcp.f32 %v460_v62 }
 0x1d8   : > { %980 = vrcp.f32 %v459_v63  ;;  %v454_v0 = vpop.xlane.xlu1 %453  ;;  %v452_v1 = vpop.xlane.xlu0 %451 }
 0x1d9   : > { %v462_v5 = vadd.f32 1e-09, %v454_v0  ;;  %v461_v9 = vadd.f32 1e-09, %v452_v1  ;;  %v971_v10 = vpop.eup %970 }
 0x1da   : > { %v973_v13 = vpop.eup %972  ;;  %v473_v16 = vmul.f32 %v971_v10, %v1107_v31 }
 0x1db   : > { %982 = vrcp.f32 %v462_v5  ;;  %v471_v18 = vmul.f32 %v973_v13, %v1109_v32 }
 0x1dc   : > { %984 = vrcp.f32 %v461_v9 }
 0x1dd   : > { %v975_v14 = vpop.eup %974 }
 0x1de   : > { %v977_v15 = vpop.eup %976  ;;  %v474_v17 = vmul.f32 %v975_v14, %v1111_v33 }
 0x1df   : > { %v472_v19 = vmul.f32 %v977_v15, %v1113_v34 }
 0x1e0   : > { %v480_v20 = vpack.c.bf16 %v474_v17, %v473_v16 }
 0x1e1   : > { %v979_v21 = vpop.eup %978  ;;  %v479_v22 = vpack.c.bf16 %v472_v19, %v471_v18 }
 0x1e2   : > { %v981_v23 = vpop.eup %980  ;;  %v476_v24 = vmul.f32 %v979_v21, %v1115_v35 }
 0x1e3   : > { %926 = vmatprep.mubr.bf16.mxu1 %v479_v22  ;;  %v475_v25 = vmul.f32 %v981_v23, %v1117_v36 }
 0x1e4   : > { %927 = vmatmul.mubr.bf16.vlgmr.msra.gmra.mrb[0].mxu1 %v480_v20 }
 0x1e5   : > { %v983_v26 = vpop.eup %982  ;;  %v481_v27 = vpack.c.bf16 %v476_v24, %v475_v25 }
 0x1e6   : > { %v985_v28 = vpop.eup %984  ;;  %v478_v29 = vmul.f32 %v983_v26, %v1119_v37 }
 0x1e7   : > { %930 = vmatprep.mubr.bf16.mxu1 %v481_v27  ;;  %v477_v30 = vmul.f32 %v985_v28, %v1121_v38 }
 0x1e9   : > { %v482_v31 = vpack.c.bf16 %v478_v29, %v477_v30 }
 0x1ec   : > { %931 = vmatmul.mubr.bf16.gmra.mrb[4].mxu1 %v482_v31 }
 0x2b7   : > { %v1162_v32 = vpop.f32.mrb[0].mxu1 }
 0x2b8   : > { %v1164_v33 = vpop.f32.mrb[1].mxu1  ;;  %v618_v34 = vsel %vm288_vm0, %v1162_v32, 0.0  ;;  %v647_v39 = vmul.f32 %v1162_v32, %v1162_v32 }
 0x2b9   : > { %619 = vadd.xlane.f32.xlu0 %v618_v34  ;;  %v1168_v35 = vpop.f32.mrb[2].mxu1  ;;  %v612_v38 = vsel %vm288_vm0, %v1164_v33, 0.0  ;;  %v645_v45 = vmul.f32 %v1164_v33, %v1164_v33 }
 0x2ba   : > { %v1170_v36 = vpop.f32.mrb[3].mxu1  ;;  %v621_v37 = vsel %vm288_vm0, %v1168_v35, 0.0  ;;  %v648_v41 = vmul.f32 %v1168_v35, %v1168_v35  ;;  %v659_v44 = vsel %vm288_vm0, %v647_v39, 0.0 }
 0x2bb   : > { %622 = vadd.xlane.f32.xlu1 %v621_v37  ;;  %v615_v40 = vsel %vm288_vm0, %v1170_v36, 0.0  ;;  %v646_v49 = vmul.f32 %v1170_v36, %v1170_v36  ;;  %v653_v50 = vsel %vm288_vm0, %v645_v45, 0.0 }
 0x2bc   : > { %v662_v48 = vsel %vm288_vm0, %v648_v41, 0.0 }
 0x2bd   : > { %613 = vadd.xlane.f32.xlu0 %v612_v38  ;;  %v656_v51 = vsel %vm288_vm0, %v646_v49, 0.0 }
 0x2bf   : > { %616 = vadd.xlane.f32.xlu1 %v615_v40  ;;  %v1182_v42 = vpop.f32.mrb[4].mxu1 }
 0x2c0   : > { %v1184_v43 = vpop.f32.mrb[5].mxu1  ;;  %v630_v52 = vsel %vm288_vm0, %v1182_v42, 0.0  ;;  %v651_v59 = vmul.f32 %v1182_v42, %v1182_v42 }
 0x2c1   : > { %660 = vadd.xlane.f32.xlu0 %v659_v44  ;;  %v1189_v46 = vpop.f32.mrb[6].mxu1  ;;  %v624_v54 = vsel %vm288_vm0, %v1184_v43, 0.0  ;;  %v649_v55 = vmul.f32 %v1184_v43, %v1184_v43 }
 0x2c2   : > { %v1191_v47 = vpop.f32.mrb[7].mxu1  ;;  %v633_v53 = vsel %vm288_vm0, %v1189_v46, 0.0  ;;  %v652_v61 = vmul.f32 %v1189_v46, %v1189_v46  ;;  %v671_v62 = vsel %vm288_vm0, %v651_v59, 0.0 }
 0x2c3   : > { %663 = vadd.xlane.f32.xlu1 %v662_v48  ;;  %v650_v56 = vmul.f32 %v1191_v47, %v1191_v47  ;;  %v627_v57 = vsel %vm288_vm0, %v1191_v47, 0.0  ;;  %v665_v58 = vsel %vm288_vm0, %v649_v55, 0.0  ;;  %v1237_v55 = vld [vmem:[%s1325_s4] ss:$0 sm:$0xff] }
 0x2c4   : > { %v674_v63 = vsel %vm288_vm0, %v652_v61, 0.0 }
 0x2c5   : > { %654 = vadd.xlane.f32.xlu0 %v653_v50  ;;  %v668_v60 = vsel %vm288_vm0, %v650_v56, 0.0 }
 0x2c7   : > { %657 = vadd.xlane.f32.xlu1 %v656_v51 }
 0x2c9   : > { %631 = vadd.xlane.f32.xlu0 %v630_v52 }
 0x2cb   : > { %634 = vadd.xlane.f32.xlu1 %v633_v53 }
 0x2cd   : > { %625 = vadd.xlane.f32.xlu0 %v624_v54 }
 0x2cf   : > { %628 = vadd.xlane.f32.xlu1 %v627_v57 }
 0x2d1   : > { %666 = vadd.xlane.f32.xlu0 %v665_v58 }
 0x2d3   : > { %669 = vadd.xlane.f32.xlu1 %v668_v60 }
 0x2d5   : > { %672 = vadd.xlane.f32.xlu0 %v671_v62 }
 0x2d7   : > { %675 = vadd.xlane.f32.xlu1 %v674_v63 }
 0x346   : > { %v620_v0 = vpop.xlane.xlu0 %619 }
 0x347   : > { %v639_v9 = vmul.f32 0.03125, %v620_v0 }
 0x348   : > { %v623_v1 = vpop.xlane.xlu1 %622 }
 0x349   : > { %v1218_v13 = vmul.f32 0.03125, %v623_v1  ;;  %v687_v15 = vmul.f32 %v639_v9, %v639_v9  ;;  %v742_v1 = vsub.f32 %v1162_v32, %v639_v9 }
 0x34a   : > { %v614_v5 = vpop.xlane.xlu0 %613 }
 0x34b   : > { %v1220_v16 = vmul.f32 0.03125, %v614_v5  ;;  %v688_v20 = vmul.f32 %v1218_v13, %v1218_v13  ;;  %v743_v5 = vsub.f32 %v1168_v35, %v1218_v13 }
 0x34c   : > { %v617_v10 = vpop.xlane.xlu1 %616 }
 0x34d   : > { %v1222_v18 = vmul.f32 0.03125, %v617_v10  ;;  %v685_v24 = vmul.f32 %v1220_v16, %v1220_v16  ;;  %v740_v32 = vsub.f32 %v1164_v33, %v1220_v16 }
 0x34e   : > { %v661_v14 = vpop.xlane.xlu0 %660 }
 0x34f   : > { %v679_v17 = vmul.f32 0.03125, %v661_v14  ;;  %v686_v28 = vmul.f32 %v1222_v18, %v1222_v18 }
 0x350   : > { %v664_v19 = vpop.xlane.xlu1 %663 }
 0x351   : > { %v695_v21 = vsub.f32 %v679_v17, %v687_v15  ;;  %v680_v22 = vmul.f32 0.03125, %v664_v19  ;;  %v1254_v17 = vld [vmem:[%s1326_s5] ss:$0 sm:$0xff] }
 0x352   : > { %v655_v23 = vpop.xlane.xlu0 %654 }
 0x353   : > { %v703_v25 = vmax.f32 %v695_v21, 0.0  ;;  %v696_v26 = vsub.f32 %v680_v22, %v688_v20  ;;  %v677_v27 = vmul.f32 0.03125, %v655_v23 }
 0x354   : > { %v658_v29 = vpop.xlane.xlu1 %657 }
 0x355   : > { %v712_v30 = vadd.f32 1e-06, %v703_v25  ;;  %v704_v31 = vmax.f32 %v696_v26, 0.0  ;;  %v693_v34 = vsub.f32 %v677_v27, %v685_v24  ;;  %v678_v37 = vmul.f32 0.03125, %v658_v29 }
 0x356   : > { %v632_v38 = vpop.xlane.xlu0 %631  ;;  %v741_v29 = vsub.f32 %v1170_v36, %v1222_v18 }
 0x357   : > { %986 = vrsqrt.f32 %v712_v30  ;;  %v713_v39 = vadd.f32 1e-06, %v704_v31  ;;  %v701_v40 = vmax.f32 %v693_v34, 0.0  ;;  %v694_v41 = vsub.f32 %v678_v37, %v686_v28 }
 0x358   : > { %v635_v44 = vpop.xlane.xlu1 %634  ;;  %v1239_v56 = vmul.f32 0.03125, %v632_v38 }
 0x359   : > { %988 = vrsqrt.f32 %v713_v39  ;;  %v710_v45 = vadd.f32 1e-06, %v701_v40  ;;  %v702_v48 = vmax.f32 %v694_v41, 0.0  ;;  %v1243_v59 = vmul.f32 0.03125, %v635_v44 }
 0x35a   : > { %v626_v49 = vpop.xlane.xlu0 %625  ;;  %v691_v19 = vmul.f32 %v1239_v56, %v1239_v56 }
 0x35b   : > { %990 = vrsqrt.f32 %v710_v45  ;;  %v711_v50 = vadd.f32 1e-06, %v702_v48  ;;  %v1230_v51 = vmul.f32 0.03125, %v626_v49  ;;  %v692_v13 = vmul.f32 %v1243_v59, %v1243_v59 }
 0x35c   : > { %v629_v52 = vpop.xlane.xlu1 %628 }
 0x35d   : > { %992 = vrsqrt.f32 %v711_v50  ;;  %v1232_v53 = vmul.f32 0.03125, %v629_v52  ;;  %v689_v57 = vmul.f32 %v1230_v51, %v1230_v51 }
 0x35e   : > { %v667_v54 = vpop.xlane.xlu0 %666 }
 0x35f   : > { %v681_v58 = vmul.f32 0.03125, %v667_v54  ;;  %v690_v62 = vmul.f32 %v1232_v53, %v1232_v53 }
 0x360   : > { %v670_v60 = vpop.xlane.xlu1 %669 }
 0x361   : > { %v987_v61 = vpop.eup %986  ;;  %v697_v63 = vsub.f32 %v681_v58, %v689_v57  ;;  %v682_v0 = vmul.f32 0.03125, %v670_v60 }
 0x362   : > { %v734_v10 = vmul.f32 %v987_v61, %v1237_v55  ;;  %v673_v14 = vpop.xlane.xlu0 %672 }
 0x363   : > { %v989_v15 = vpop.eup %988  ;;  %v705_v20 = vmax.f32 %v697_v63, 0.0  ;;  %v698_v21 = vsub.f32 %v682_v0, %v690_v62  ;;  %v683_v22 = vmul.f32 0.03125, %v673_v14  ;;  %v744_v62 = vsub.f32 %v1184_v43, %v1230_v51 }
 0x364   : > { %v750_v9 = vmul.f32 %v742_v1, %v734_v10  ;;  %v735_v35 = vmul.f32 %v989_v15, %v1237_v55  ;;  %v676_v23 = vpop.xlane.xlu1 %675  ;;  %v745_v0 = vsub.f32 %v1191_v47, %v1232_v53  ;;  %v746_v10 = vsub.f32 %v1182_v42, %v1239_v56 }
 0x365   : > { %v991_v24 = vpop.eup %990  ;;  %v714_v25 = vadd.f32 1e-06, %v705_v20  ;;  %v706_v26 = vmax.f32 %v698_v21, 0.0  ;;  %v699_v27 = vsub.f32 %v683_v22, %v691_v19  ;;  %v684_v28 = vmul.f32 0.03125, %v676_v23 }
 0x366   : > { %v765_v30 = vadd.f32 %v1254_v17, %v750_v9  ;;  %v751_v31 = vmul.f32 %v743_v5, %v735_v35  ;;  %v732_v33 = vmul.f32 %v991_v24, %v1237_v55  ;;  %v747_v19 = vsub.f32 %v1189_v46, %v1243_v59 }
 0x367   : > { %v993_v16 = vpop.eup %992  ;;  %994 = vrsqrt.f32 %v714_v25  ;;  %v715_v34 = vadd.f32 1e-06, %v706_v26  ;;  %v707_v37 = vmax.f32 %v699_v27, 0.0  ;;  %v700_v38 = vsub.f32 %v684_v28, %v692_v13 }
 0x368   : > { %v773_v39 = vadd.f32 %v765_v30, %v1071_v4  ;;  %v766_v40 = vadd.f32 %v1254_v17, %v751_v31  ;;  %v748_v41 = vmul.f32 %v740_v32, %v732_v33  ;;  %v733_v44 = vmul.f32 %v993_v16, %v1237_v55 }
 0x369   : > { %996 = vrsqrt.f32 %v715_v34  ;;  %v716_v36 = vadd.f32 1e-06, %v707_v37  ;;  %v708_v18 = vmax.f32 %v700_v38, 0.0 }
 0x36a   : > { %v781_v45 = vmax.f32 %v773_v39, 0.0  ;;  %v774_v4 = vadd.f32 %v766_v40, %v1075_v6  ;;  %v763_v48 = vadd.f32 %v1254_v17, %v748_v41  ;;  %v749_v49 = vmul.f32 %v741_v29, %v733_v44 }
 0x36b   : > { %998 = vrsqrt.f32 %v716_v36  ;;  %v717_v50 = vadd.f32 1e-06, %v708_v18 }
 0x36c   : > { %789 = vst.msk [vmem:[%s1275_s10 + $0x10] sm:$0xff] %vm288_vm0, %v781_v45  ;;  %v782_v52 = vmax.f32 %v774_v4, 0.0  ;;  %v771_v54 = vadd.f32 %v763_v48, %v1067_v2  ;;  %v764_v57 = vadd.f32 %v1254_v17, %v749_v49 }
 0x36d   : > { %1000 = vrsqrt.f32 %v717_v50 }
 0x36e   : > { %790 = vst.msk [vmem:[%s1275_s10 + $0x18] sm:$0xff] %vm288_vm0, %v782_v52  ;;  %v779_v58 = vmax.f32 %v771_v54, 0.0  ;;  %v772_v60 = vadd.f32 %v764_v57, %v1069_v3 }
 0x370   : > { %787 = vst.msk [vmem:[%s1275_s10] sm:$0xff] %vm288_vm0, %v779_v58  ;;  %v780_v6 = vmax.f32 %v772_v60, 0.0 }
 0x371   : > { %v995_v61 = vpop.eup %994 }
 0x372   : > { %788 = vst.msk [vmem:[%s1275_s10 + $0x8] sm:$0xff] %vm288_vm0, %v780_v6  ;;  %v736_v63 = vmul.f32 %v995_v61, %v1237_v55 }
 0x373   : > { %v997_v2 = vpop.eup %996 }
 0x374   : > { %v752_v1 = vmul.f32 %v744_v62, %v736_v63  ;;  %v737_v5 = vmul.f32 %v997_v2, %v1237_v55 }
 0x375   : > { %v999_v3 = vpop.eup %998 }
 0x376   : > { %v767_v14 = vadd.f32 %v1254_v17, %v752_v1  ;;  %v753_v15 = vmul.f32 %v745_v0, %v737_v5  ;;  %v738_v43 = vmul.f32 %v999_v3, %v1237_v55 }
 0x377   : > { %v1001_v51 = vpop.eup %1000 }
 0x378   : > { %v775_v47 = vadd.f32 %v767_v14, %v1077_v7  ;;  %v768_v53 = vadd.f32 %v1254_v17, %v753_v15  ;;  %v754_v20 = vmul.f32 %v746_v10, %v738_v43  ;;  %v739_v21 = vmul.f32 %v1001_v51, %v1237_v55 }
 0x37a   : > { %v783_v42 = vmax.f32 %v775_v47, 0.0  ;;  %v776_v56 = vadd.f32 %v768_v53, %v1079_v8  ;;  %v769_v22 = vadd.f32 %v1254_v17, %v754_v20  ;;  %v755_v32 = vmul.f32 %v747_v19, %v739_v21 }
 0x37c   : > { %791 = vst.msk [vmem:[%s1275_s10 + $0x20] sm:$0xff] %vm288_vm0, %v783_v42  ;;  %v784_v9 = vmax.f32 %v776_v56, 0.0  ;;  %v777_v46 = vadd.f32 %v769_v22, %v1088_v11  ;;  %v770_v59 = vadd.f32 %v1254_v17, %v755_v32 }
 0x37e   : > { %792 = vst.msk [vmem:[%s1275_s10 + $0x28] sm:$0xff] %vm288_vm0, %v784_v9  ;;  %v785_v7 = vmax.f32 %v777_v46, 0.0  ;;  %v778_v35 = vadd.f32 %v770_v59, %v1090_v12 }
 0x380   : > { %793 = vst.msk [vmem:[%s1275_s10 + $0x30] sm:$0xff] %vm288_vm0, %v785_v7  ;;  %v786_v55 = vmax.f32 %v778_v35, 0.0 }
 0x382   : > { %794 = vst.msk [vmem:[%s1275_s10 + $0x38] sm:$0xff] %vm288_vm0, %v786_v55 }
 0x383 PF: > { %s16_s21 = sadd.s32 1, %s1008_s21  }
 0x384   : > { %p13_p4 = scmp.ge.s32.totalorder %s16_s21, 4  }
 0x386   :  { %15 = sbr.rel (!%p13_p4) target bundleno = 1 (0x1), region = 74 }

</bundles_post_ra>
